<compile_context>
chip_gen: v7x
topology: tpu7x:2x2x1
jax: 0.10.0
libtpu: 0.0.40
codegen_flags: <defaults>
</compile_context>

<pallas_src>
import math

import jax
import jax.numpy as jnp
from jax.experimental import pallas as pl
from jax.experimental.pallas import tpu as pltpu

# Small synthetic config (structure of EncoderLayer: d_model, d_k, d_v, h, d_ff)
D_MODEL = 32
D_K = 8
D_V = 8
H = 4
D_FF = 64
LN_EPS = 1e-5


def _layer_norm_fused(x, gamma, beta, eps=LN_EPS):
    """One-pass LayerNorm statistics: var = E[x^2] - E[x]^2 (one reduce pair)."""
    inv_n = 1.0 / x.shape[-1]
    s1 = jnp.sum(x, axis=-1, keepdims=True)
    s2 = jnp.sum(x * x, axis=-1, keepdims=True)
    mu = s1 * inv_n
    var = s2 * inv_n - mu * mu
    return (x - mu) * jax.lax.rsqrt(var + eps) * gamma + beta


def _layer_norm_ref(x, gamma, beta, eps=LN_EPS):
    """Two-pass LayerNorm (matches torch.nn.LayerNorm) for the reference."""
    mu = jnp.mean(x, axis=-1, keepdims=True)
    var = jnp.mean((x - mu) ** 2, axis=-1, keepdims=True)
    return (x - mu) * jax.lax.rsqrt(var + eps) * gamma + beta


def encoder_layer_kernel(
    q_ref, k_ref, v_ref, pos_ref, lg_ref,
    wq_ref, bq_ref, wk_ref, bk_ref, wv_ref, bv_ref, wo_ref, bo_ref,
    g_mha_ref, b_mha_ref, g_ln_ref, b_ln_ref,
    w1_ref, b1_ref, w2_ref, b2_ref, g_ff_ref, b_ff_ref,
    o_ref,
):
    f32 = jnp.float32

    queries = q_ref[...]                       # (N, D)   (one batch per grid step)
    pos = pos_ref[...]                         # (N, D)
    q_in = queries + pos
    k_in = k_ref[...] + pos
    values = v_ref[...]
    n = q_in.shape[0]                          # N (static)

    # Fused full-width projections: one K=D matmul per tensor.  The softmax
    # scale 1/sqrt(d_k) is already folded into wq/bq by the wrapper.
    Q = jnp.dot(q_in, wq_ref[...], preferred_element_type=f32) + bq_ref[...]   # (N, H*d_k)
    K = jnp.dot(k_in, wk_ref[...], preferred_element_type=f32) + bk_ref[...]   # (N, H*d_k)
    V = jnp.dot(values, wv_ref[...], preferred_element_type=f32) + bv_ref[...] # (N, H*d_v)

    # Per-head scores stacked along sublanes -> one (H*N, N) array so the whole
    # softmax chain (max / exp / sum / approx reciprocal) runs once for all
    # heads.  lg_ref is the pre-computed log(clip(w_g, 1e-6)) in the same
    # (head-major rows) layout, so no mask / no in-kernel reshape is needed.
    # TODO(synk): attention_mask / attention_weights are None in this config and are not wired in.
    s_rows = jnp.concatenate(
        [jnp.einsum("qd,kd->qk",
                    Q[:, h * D_K:(h + 1) * D_K],
                    K[:, h * D_K:(h + 1) * D_K],
                    preferred_element_type=f32)
         for h in range(H)], axis=0)                                 # (H*N, N)

    w = lg_ref[...] + s_rows
    w = w - jnp.max(w, axis=-1, keepdims=True)
    p = jnp.exp(w)
    p = p * pl.reciprocal(jnp.sum(p, axis=-1, keepdims=True), approx=True)

    # Per-head context, concatenated lane-dense to (N, H*d_v) so fc_o is a
    # single K = H*d_v matmul (no leading-axis reduction).
    ctx = jnp.concatenate(
        [jnp.dot(p[h * n:(h + 1) * n, :],
                 V[:, h * D_V:(h + 1) * D_V],
                 preferred_element_type=f32)
         for h in range(H)], axis=1)                                 # (N, H*d_v)

    mha = jnp.dot(ctx, wo_ref[...], preferred_element_type=f32) + bo_ref[...]  # (N, D)

    # MultiHeadAttention residual + LN (residual is the q passed to mhatt).
    x = _layer_norm_fused(q_in + mha, g_mha_ref[...], b_mha_ref[...])
    # EncoderLayer residual + lnorm (residual is the original queries).
    y = _layer_norm_fused(queries + x, g_ln_ref[...], b_ln_ref[...])
    # Position-wise feed-forward with its own residual layer norm.
    h1 = jnp.maximum(
        jnp.dot(y, w1_ref[...], preferred_element_type=f32) + b1_ref[...], 0.0)
    ff = jnp.dot(h1, w2_ref[...], preferred_element_type=f32) + b2_ref[...]
    out = _layer_norm_fused(y + ff, g_ff_ref[...], b_ff_ref[...])

    # TODO(synk): with D=32 this store is lane-masked (32/128); a lane-dense
    # (N*D/128, 128) output packing would help only at much larger N*D.
    o_ref[...] = out.astype(o_ref.dtype)


@jax.jit
def encoder_layer(queries, keys, values, geo, pos, params):
    B, N, D = queries.shape
    P = params
    scale = 1.0 / math.sqrt(D_K)

    # Hoisted log(clip(geo, 1e-6)); heads folded into the sublane axis so the
    # kernel adds it straight onto the stacked per-head scores.
    log_geo = jnp.log(jnp.clip(geo, 1e-6, None)).reshape(B, H * N, N)   # (B, H*N, N)

    # Fold the 1/sqrt(d_k) softmax scale into the query projection.
    wq_s = P["wq"] * scale
    bq_s = P["bq"] * scale

    args = [
        queries, keys, values, pos, log_geo,
        wq_s, bq_s, P["wk"], P["bk"], P["wv"], P["bv"], P["wo"], P["bo"],
        P["g_mha"], P["b_mha"], P["g_ln"], P["b_ln"],
        P["w1"], P["b1"], P["w2"], P["b2"], P["g_ff"], P["b_ff"],
    ]

    # Per-batch activation blocks (leading batch dim squeezed out of the kernel).
    row_spec = pl.BlockSpec((None, N, D), lambda b: (b, 0, 0))
    lg_spec = pl.BlockSpec((None, H * N, N), lambda b: (b, 0, 0))

    def full_spec(x):
        nd = x.ndim
        return pl.BlockSpec(x.shape, lambda b, _nd=nd: (0,) * _nd)   # grid-resident

    in_specs = [row_spec, row_spec, row_spec, row_spec, lg_spec] + \
               [full_spec(a) for a in args[5:]]

    flops = B * (
        3 * 2 * N * D * (H * D_K)             # fused q/k/v projections
        + 2 * H * N * N * D_K                 # scores
        + 2 * H * N * N * D_V                 # context
        + 2 * N * (H * D_V) * D               # fc_o
        + 2 * N * D * D_FF + 2 * N * D_FF * D # feed-forward
    )
    transcendentals = B * (H * N * N + 4 * N)
    bytes_accessed = 4 * (
        4 * B * N * D + B * H * N * N + B * N * D
        + sum(int(a.size) for a in args[5:])
    )

    out = pl.pallas_call(
        encoder_layer_kernel,
        grid=(B,),
        in_specs=in_specs,
        out_specs=row_spec,
        out_shape=jax.ShapeDtypeStruct((B, N, D), queries.dtype),
        compiler_params=pltpu.CompilerParams(
            dimension_semantics=("parallel",)),   # 2 TCs on v7x; no-op on v5e/v6e
        cost_estimate=pl.CostEstimate(
            flops=flops, transcendentals=transcendentals,
            bytes_accessed=bytes_accessed),
    )(*args)

    return out


def reference(queries, keys, values, geo, pos, P):
    """Pure-JAX reference (mirrors the PyTorch module) for correctness check."""
    B, Nq, _ = queries.shape
    Nk = keys.shape[1]
    q_in = queries + pos
    k_in = keys + pos
    Q = (q_in @ P["wq"] + P["bq"]).reshape(B, Nq, H, D_K).transpose(0, 2, 1, 3)
    K = (k_in @ P["wk"] + P["bk"]).reshape(B, Nk, H, D_K).transpose(0, 2, 1, 3)
    V = (values @ P["wv"] + P["bv"]).reshape(B, Nk, H, D_V).transpose(0, 2, 1, 3)
    att = jnp.einsum("bhqd,bhkd->bhqk", Q, K) / math.sqrt(D_K)
    wmn = jnp.log(jnp.clip(geo, 1e-6, None)) + att
    p = jax.nn.softmax(wmn, axis=-1)
    oh = jnp.einsum("bhqk,bhkd->bhqd", p, V).transpose(0, 2, 1, 3).reshape(B, Nq, H * D_V)
    mha = oh @ P["wo"] + P["bo"]
    x = _layer_norm_ref(q_in + mha, P["g_mha"], P["b_mha"])
    y = _layer_norm_ref(queries + x, P["g_ln"], P["b_ln"])
    hmid = jax.nn.relu(y @ P["w1"] + P["b1"])
    ff = hmid @ P["w2"] + P["b2"]
    return _layer_norm_ref(y + ff, P["g_ff"], P["b_ff"])


def init_params(key):
    ks = jax.random.split(key, 16)
    n = lambda k, s, sc=0.05: (sc * jax.random.normal(k, s)).astype(jnp.float32)
    P = {
        "wq": n(ks[0], (D_MODEL, H * D_K)), "bq": n(ks[1], (1, H * D_K)),
        "wk": n(ks[2], (D_MODEL, H * D_K)), "bk": n(ks[3], (1, H * D_K)),
        "wv": n(ks[4], (D_MODEL, H * D_V)), "bv": n(ks[5], (1, H * D_V)),
        "wo": n(ks[6], (H * D_V, D_MODEL)), "bo": n(ks[7], (1, D_MODEL)),
        "g_mha": 1.0 + n(ks[8], (1, D_MODEL)), "b_mha": n(ks[9], (1, D_MODEL)),
        "g_ln": 1.0 + n(ks[10], (1, D_MODEL)), "b_ln": n(ks[11], (1, D_MODEL)),
        "w1": n(ks[12], (D_MODEL, D_FF)), "b1": n(ks[13], (1, D_FF)),
        "w2": n(ks[14], (D_FF, D_MODEL)), "b2": n(ks[15], (1, D_MODEL)),
        "g_ff": jnp.ones((1, D_MODEL), jnp.float32),
        "b_ff": jnp.zeros((1, D_MODEL), jnp.float32),
    }
    return P


if __name__ == "__main__":
    B, N = 2, 8
    key = jax.random.PRNGKey(0)
    kq, kk, kv, kg, kpos, kp = jax.random.split(key, 6)

    queries = jax.random.normal(kq, (B, N, D_MODEL), jnp.float32)
    keys = jax.random.normal(kk, (B, N, D_MODEL), jnp.float32)
    values = jax.random.normal(kv, (B, N, D_MODEL), jnp.float32)
    # relative geometry weights are non-negative (ReLU of geometry embedding in DLCT)
    geo = jax.random.uniform(kg, (B, H, N, N), jnp.float32, minval=1e-3, maxval=1.0)
    pos = jax.random.normal(kpos, (B, N, D_MODEL), jnp.float32)
    params = init_params(kp)

    out = encoder_layer(queries, keys, values, geo, pos, params)
    out = jax.block_until_ready(out)

    ref = reference(queries, keys, values, geo, pos, params)
    assert out.shape == (B, N, D_MODEL)
    err = float(jnp.max(jnp.abs(out - ref)))
    # tolerance 1e-3 to cover pl.reciprocal(approx=True) + one-pass LN variance
    assert jnp.allclose(out, ref, rtol=1e-3, atol=1e-3), err

    print("KERNEL_OK")
</pallas_src>

<mosaic_0001>
module attributes {stable_mosaic.version = 11 : i64} {
  func.func @encoder_layer_kernel(%arg0: i32, %arg1: memref<1x8x32xf32, #tpu.memory_space<vmem>>, %arg2: memref<1x8x32xf32, #tpu.memory_space<vmem>>, %arg3: memref<1x8x32xf32, #tpu.memory_space<vmem>>, %arg4: memref<1x8x32xf32, #tpu.memory_space<vmem>>, %arg5: memref<1x32x8xf32, #tpu.memory_space<vmem>>, %arg6: memref<32x32xf32, #tpu.memory_space<vmem>>, %arg7: memref<1x32xf32, #tpu.memory_space<vmem>>, %arg8: memref<32x32xf32, #tpu.memory_space<vmem>>, %arg9: memref<1x32xf32, #tpu.memory_space<vmem>>, %arg10: memref<32x32xf32, #tpu.memory_space<vmem>>, %arg11: memref<1x32xf32, #tpu.memory_space<vmem>>, %arg12: memref<32x32xf32, #tpu.memory_space<vmem>>, %arg13: memref<1x32xf32, #tpu.memory_space<vmem>>, %arg14: memref<1x32xf32, #tpu.memory_space<vmem>>, %arg15: memref<1x32xf32, #tpu.memory_space<vmem>>, %arg16: memref<1x32xf32, #tpu.memory_space<vmem>>, %arg17: memref<1x32xf32, #tpu.memory_space<vmem>>, %arg18: memref<32x64xf32, #tpu.memory_space<vmem>>, %arg19: memref<1x64xf32, #tpu.memory_space<vmem>>, %arg20: memref<64x32xf32, #tpu.memory_space<vmem>>, %arg21: memref<1x32xf32, #tpu.memory_space<vmem>>, %arg22: memref<1x32xf32, #tpu.memory_space<vmem>>, %arg23: memref<1x32xf32, #tpu.memory_space<vmem>>, %arg24: memref<1x8x32xf32, #tpu.memory_space<vmem>>) attributes {dimension_semantics = [#tpu.dimension_semantics<parallel>], iteration_bounds = array<i64: 2>, scalar_prefetch = 0 : i64, scratch_operands = 0 : i64, tpu.core_type = #tpu.core_type<tc>, window_params = [{transform_indices = @transform_0, window_bounds = array<i64: 1, 8, 32>}, {transform_indices = @transform_1, window_bounds = array<i64: 1, 8, 32>}, {transform_indices = @transform_2, window_bounds = array<i64: 1, 8, 32>}, {transform_indices = @transform_3, window_bounds = array<i64: 1, 8, 32>}, {transform_indices = @transform_4, window_bounds = array<i64: 1, 32, 8>}, {pipeline_mode = #tpu.pipeline_mode<synchronous>, transform_indices = @transform_5, window_bounds = array<i64: 32, 32>}, {pipeline_mode = #tpu.pipeline_mode<synchronous>, transform_indices = @transform_6, window_bounds = array<i64: 1, 32>}, {pipeline_mode = #tpu.pipeline_mode<synchronous>, transform_indices = @transform_7, window_bounds = array<i64: 32, 32>}, {pipeline_mode = #tpu.pipeline_mode<synchronous>, transform_indices = @transform_8, window_bounds = array<i64: 1, 32>}, {pipeline_mode = #tpu.pipeline_mode<synchronous>, transform_indices = @transform_9, window_bounds = array<i64: 32, 32>}, {pipeline_mode = #tpu.pipeline_mode<synchronous>, transform_indices = @transform_10, window_bounds = array<i64: 1, 32>}, {pipeline_mode = #tpu.pipeline_mode<synchronous>, transform_indices = @transform_11, window_bounds = array<i64: 32, 32>}, {pipeline_mode = #tpu.pipeline_mode<synchronous>, transform_indices = @transform_12, window_bounds = array<i64: 1, 32>}, {pipeline_mode = #tpu.pipeline_mode<synchronous>, transform_indices = @transform_13, window_bounds = array<i64: 1, 32>}, {pipeline_mode = #tpu.pipeline_mode<synchronous>, transform_indices = @transform_14, window_bounds = array<i64: 1, 32>}, {pipeline_mode = #tpu.pipeline_mode<synchronous>, transform_indices = @transform_15, window_bounds = array<i64: 1, 32>}, {pipeline_mode = #tpu.pipeline_mode<synchronous>, transform_indices = @transform_16, window_bounds = array<i64: 1, 32>}, {pipeline_mode = #tpu.pipeline_mode<synchronous>, transform_indices = @transform_17, window_bounds = array<i64: 32, 64>}, {pipeline_mode = #tpu.pipeline_mode<synchronous>, transform_indices = @transform_18, window_bounds = array<i64: 1, 64>}, {pipeline_mode = #tpu.pipeline_mode<synchronous>, transform_indices = @transform_19, window_bounds = array<i64: 64, 32>}, {pipeline_mode = #tpu.pipeline_mode<synchronous>, transform_indices = @transform_20, window_bounds = array<i64: 1, 32>}, {pipeline_mode = #tpu.pipeline_mode<synchronous>, transform_indices = @transform_21, window_bounds = array<i64: 1, 32>}, {pipeline_mode = #tpu.pipeline_mode<synchronous>, transform_indices = @transform_22, window_bounds = array<i64: 1, 32>}, {transform_indices = @transform_23, window_bounds = array<i64: 1, 8, 32>}]} {
    %c0 = arith.constant 0 : index
    %c0_0 = arith.constant 0 : index
    %c0_1 = arith.constant 0 : index
    %0 = vector.load %arg1[%c0, %c0_0, %c0_1] : memref<1x8x32xf32, #tpu.memory_space<vmem>>, vector<1x8x32xf32>
    %1 = vector.shape_cast %0 : vector<1x8x32xf32> to vector<8x32xf32>
    %c0_2 = arith.constant 0 : index
    %c0_3 = arith.constant 0 : index
    %c0_4 = arith.constant 0 : index
    %2 = vector.load %arg4[%c0_2, %c0_3, %c0_4] : memref<1x8x32xf32, #tpu.memory_space<vmem>>, vector<1x8x32xf32>
    %3 = vector.shape_cast %2 : vector<1x8x32xf32> to vector<8x32xf32>
    %4 = arith.addf %1, %3 : vector<8x32xf32>
    %c0_5 = arith.constant 0 : index
    %c0_6 = arith.constant 0 : index
    %c0_7 = arith.constant 0 : index
    %5 = vector.load %arg2[%c0_5, %c0_6, %c0_7] : memref<1x8x32xf32, #tpu.memory_space<vmem>>, vector<1x8x32xf32>
    %6 = vector.shape_cast %5 : vector<1x8x32xf32> to vector<8x32xf32>
    %7 = arith.addf %6, %3 : vector<8x32xf32>
    %c0_8 = arith.constant 0 : index
    %c0_9 = arith.constant 0 : index
    %c0_10 = arith.constant 0 : index
    %8 = vector.load %arg3[%c0_8, %c0_9, %c0_10] : memref<1x8x32xf32, #tpu.memory_space<vmem>>, vector<1x8x32xf32>
    %9 = vector.shape_cast %8 : vector<1x8x32xf32> to vector<8x32xf32>
    %c0_11 = arith.constant 0 : index
    %c0_12 = arith.constant 0 : index
    %10 = vector.load %arg6[%c0_11, %c0_12] : memref<32x32xf32, #tpu.memory_space<vmem>>, vector<32x32xf32>
    %cst = arith.constant dense<0.000000e+00> : vector<8x32xf32>
    %11 = tpu.matmul %4, %10, %cst {dimension_numbers = #tpu.dot_dimension_numbers<[1], [0], [0], [1], [0, 0, 1, 1], [], []>} : vector<8x32xf32>, vector<32x32xf32>, vector<8x32xf32> -> vector<8x32xf32>
    %c0_13 = arith.constant 0 : index
    %c0_14 = arith.constant 0 : index
    %12 = vector.load %arg7[%c0_13, %c0_14] : memref<1x32xf32, #tpu.memory_space<vmem>>, vector<1x32xf32>
    %13 = vector.broadcast %12 : vector<1x32xf32> to vector<8x32xf32>
    %14 = arith.addf %11, %13 : vector<8x32xf32>
    %c0_15 = arith.constant 0 : index
    %c0_16 = arith.constant 0 : index
    %15 = vector.load %arg8[%c0_15, %c0_16] : memref<32x32xf32, #tpu.memory_space<vmem>>, vector<32x32xf32>
    %cst_17 = arith.constant dense<0.000000e+00> : vector<8x32xf32>
    %16 = tpu.matmul %7, %15, %cst_17 {dimension_numbers = #tpu.dot_dimension_numbers<[1], [0], [0], [1], [0, 0, 1, 1], [], []>} : vector<8x32xf32>, vector<32x32xf32>, vector<8x32xf32> -> vector<8x32xf32>
    %c0_18 = arith.constant 0 : index
    %c0_19 = arith.constant 0 : index
    %17 = vector.load %arg9[%c0_18, %c0_19] : memref<1x32xf32, #tpu.memory_space<vmem>>, vector<1x32xf32>
    %18 = vector.broadcast %17 : vector<1x32xf32> to vector<8x32xf32>
    %19 = arith.addf %16, %18 : vector<8x32xf32>
    %c0_20 = arith.constant 0 : index
    %c0_21 = arith.constant 0 : index
    %20 = vector.load %arg10[%c0_20, %c0_21] : memref<32x32xf32, #tpu.memory_space<vmem>>, vector<32x32xf32>
    %cst_22 = arith.constant dense<0.000000e+00> : vector<8x32xf32>
    %21 = tpu.matmul %9, %20, %cst_22 {dimension_numbers = #tpu.dot_dimension_numbers<[1], [0], [0], [1], [0, 0, 1, 1], [], []>} : vector<8x32xf32>, vector<32x32xf32>, vector<8x32xf32> -> vector<8x32xf32>
    %c0_23 = arith.constant 0 : index
    %c0_24 = arith.constant 0 : index
    %22 = vector.load %arg11[%c0_23, %c0_24] : memref<1x32xf32, #tpu.memory_space<vmem>>, vector<1x32xf32>
    %23 = vector.broadcast %22 : vector<1x32xf32> to vector<8x32xf32>
    %24 = arith.addf %21, %23 : vector<8x32xf32>
    %25 = vector.extract_strided_slice %14 {offsets = [0, 0], sizes = [8, 8], strides = [1, 1]} : vector<8x32xf32> to vector<8x8xf32>
    %26 = vector.extract_strided_slice %19 {offsets = [0, 0], sizes = [8, 8], strides = [1, 1]} : vector<8x32xf32> to vector<8x8xf32>
    "tpu.trace_start"() <{level = 10 : i32, message = "qd,kd->qk"}> : () -> ()
    %cst_25 = arith.constant dense<0.000000e+00> : vector<8x8xf32>
    %27 = tpu.matmul %25, %26, %cst_25 {dimension_numbers = #tpu.dot_dimension_numbers<[1], [1], [0], [0], [0, 0, 1, 0], [], []>} : vector<8x8xf32>, vector<8x8xf32>, vector<8x8xf32> -> vector<8x8xf32>
    "tpu.trace_stop"() : () -> ()
    %28 = vector.extract_strided_slice %14 {offsets = [0, 8], sizes = [8, 8], strides = [1, 1]} : vector<8x32xf32> to vector<8x8xf32>
    %29 = vector.extract_strided_slice %19 {offsets = [0, 8], sizes = [8, 8], strides = [1, 1]} : vector<8x32xf32> to vector<8x8xf32>
    "tpu.trace_start"() <{level = 10 : i32, message = "qd,kd->qk"}> : () -> ()
    %cst_26 = arith.constant dense<0.000000e+00> : vector<8x8xf32>
    %30 = tpu.matmul %28, %29, %cst_26 {dimension_numbers = #tpu.dot_dimension_numbers<[1], [1], [0], [0], [0, 0, 1, 0], [], []>} : vector<8x8xf32>, vector<8x8xf32>, vector<8x8xf32> -> vector<8x8xf32>
    "tpu.trace_stop"() : () -> ()
    %31 = vector.extract_strided_slice %14 {offsets = [0, 16], sizes = [8, 8], strides = [1, 1]} : vector<8x32xf32> to vector<8x8xf32>
    %32 = vector.extract_strided_slice %19 {offsets = [0, 16], sizes = [8, 8], strides = [1, 1]} : vector<8x32xf32> to vector<8x8xf32>
    "tpu.trace_start"() <{level = 10 : i32, message = "qd,kd->qk"}> : () -> ()
    %cst_27 = arith.constant dense<0.000000e+00> : vector<8x8xf32>
    %33 = tpu.matmul %31, %32, %cst_27 {dimension_numbers = #tpu.dot_dimension_numbers<[1], [1], [0], [0], [0, 0, 1, 0], [], []>} : vector<8x8xf32>, vector<8x8xf32>, vector<8x8xf32> -> vector<8x8xf32>
    "tpu.trace_stop"() : () -> ()
    %34 = vector.extract_strided_slice %14 {offsets = [0, 24], sizes = [8, 8], strides = [1, 1]} : vector<8x32xf32> to vector<8x8xf32>
    %35 = vector.extract_strided_slice %19 {offsets = [0, 24], sizes = [8, 8], strides = [1, 1]} : vector<8x32xf32> to vector<8x8xf32>
    "tpu.trace_start"() <{level = 10 : i32, message = "qd,kd->qk"}> : () -> ()
    %cst_28 = arith.constant dense<0.000000e+00> : vector<8x8xf32>
    %36 = tpu.matmul %34, %35, %cst_28 {dimension_numbers = #tpu.dot_dimension_numbers<[1], [1], [0], [0], [0, 0, 1, 0], [], []>} : vector<8x8xf32>, vector<8x8xf32>, vector<8x8xf32> -> vector<8x8xf32>
    "tpu.trace_stop"() : () -> ()
    %37 = tpu.concatenate %27, %30, %33, %36 in 0 : vector<8x8xf32>, vector<8x8xf32>, vector<8x8xf32>, vector<8x8xf32> -> vector<32x8xf32>
    %c0_29 = arith.constant 0 : index
    %c0_30 = arith.constant 0 : index
    %c0_31 = arith.constant 0 : index
    %38 = vector.load %arg5[%c0_29, %c0_30, %c0_31] : memref<1x32x8xf32, #tpu.memory_space<vmem>>, vector<1x32x8xf32>
    %39 = vector.shape_cast %38 : vector<1x32x8xf32> to vector<32x8xf32>
    %40 = arith.addf %39, %37 : vector<32x8xf32>
    %cst_32 = arith.constant dense<0xFF800000> : vector<32xf32>
    %41 = vector.multi_reduction <maximumf>, %40, %cst_32 [1] : vector<32x8xf32> to vector<32xf32>
    %42 = vector.shape_cast %41 : vector<32xf32> to vector<32x1xf32>
    %43 = vector.broadcast %42 : vector<32x1xf32> to vector<32x8xf32>
    %44 = arith.subf %40, %43 : vector<32x8xf32>
    %45 = math.exp %44 : vector<32x8xf32>
    %cst_33 = arith.constant dense<0.000000e+00> : vector<32xf32>
    %46 = vector.multi_reduction <add>, %45, %cst_33 [1] : vector<32x8xf32> to vector<32xf32>
    %47 = vector.shape_cast %46 : vector<32xf32> to vector<32x1xf32>
    %48 = tpu.reciprocal %47 {approx = true} : vector<32x1xf32> -> vector<32x1xf32>
    %49 = vector.broadcast %48 : vector<32x1xf32> to vector<32x8xf32>
    %50 = arith.mulf %45, %49 : vector<32x8xf32>
    %51 = vector.extract_strided_slice %50 {offsets = [0, 0], sizes = [8, 8], strides = [1, 1]} : vector<32x8xf32> to vector<8x8xf32>
    %52 = vector.extract_strided_slice %24 {offsets = [0, 0], sizes = [8, 8], strides = [1, 1]} : vector<8x32xf32> to vector<8x8xf32>
    %cst_34 = arith.constant dense<0.000000e+00> : vector<8x8xf32>
    %53 = tpu.matmul %51, %52, %cst_34 {dimension_numbers = #tpu.dot_dimension_numbers<[1], [0], [0], [1], [0, 0, 1, 1], [], []>} : vector<8x8xf32>, vector<8x8xf32>, vector<8x8xf32> -> vector<8x8xf32>
    %54 = vector.extract_strided_slice %50 {offsets = [8, 0], sizes = [8, 8], strides = [1, 1]} : vector<32x8xf32> to vector<8x8xf32>
    %55 = vector.extract_strided_slice %24 {offsets = [0, 8], sizes = [8, 8], strides = [1, 1]} : vector<8x32xf32> to vector<8x8xf32>
    %cst_35 = arith.constant dense<0.000000e+00> : vector<8x8xf32>
    %56 = tpu.matmul %54, %55, %cst_35 {dimension_numbers = #tpu.dot_dimension_numbers<[1], [0], [0], [1], [0, 0, 1, 1], [], []>} : vector<8x8xf32>, vector<8x8xf32>, vector<8x8xf32> -> vector<8x8xf32>
    %57 = vector.extract_strided_slice %50 {offsets = [16, 0], sizes = [8, 8], strides = [1, 1]} : vector<32x8xf32> to vector<8x8xf32>
    %58 = vector.extract_strided_slice %24 {offsets = [0, 16], sizes = [8, 8], strides = [1, 1]} : vector<8x32xf32> to vector<8x8xf32>
    %cst_36 = arith.constant dense<0.000000e+00> : vector<8x8xf32>
    %59 = tpu.matmul %57, %58, %cst_36 {dimension_numbers = #tpu.dot_dimension_numbers<[1], [0], [0], [1], [0, 0, 1, 1], [], []>} : vector<8x8xf32>, vector<8x8xf32>, vector<8x8xf32> -> vector<8x8xf32>
    %60 = vector.extract_strided_slice %50 {offsets = [24, 0], sizes = [8, 8], strides = [1, 1]} : vector<32x8xf32> to vector<8x8xf32>
    %61 = vector.extract_strided_slice %24 {offsets = [0, 24], sizes = [8, 8], strides = [1, 1]} : vector<8x32xf32> to vector<8x8xf32>
    %cst_37 = arith.constant dense<0.000000e+00> : vector<8x8xf32>
    %62 = tpu.matmul %60, %61, %cst_37 {dimension_numbers = #tpu.dot_dimension_numbers<[1], [0], [0], [1], [0, 0, 1, 1], [], []>} : vector<8x8xf32>, vector<8x8xf32>, vector<8x8xf32> -> vector<8x8xf32>
    %63 = tpu.concatenate %53, %56, %59, %62 in 1 : vector<8x8xf32>, vector<8x8xf32>, vector<8x8xf32>, vector<8x8xf32> -> vector<8x32xf32>
    %c0_38 = arith.constant 0 : index
    %c0_39 = arith.constant 0 : index
    %64 = vector.load %arg12[%c0_38, %c0_39] : memref<32x32xf32, #tpu.memory_space<vmem>>, vector<32x32xf32>
    %cst_40 = arith.constant dense<0.000000e+00> : vector<8x32xf32>
    %65 = tpu.matmul %63, %64, %cst_40 {dimension_numbers = #tpu.dot_dimension_numbers<[1], [0], [0], [1], [0, 0, 1, 1], [], []>} : vector<8x32xf32>, vector<32x32xf32>, vector<8x32xf32> -> vector<8x32xf32>
    %c0_41 = arith.constant 0 : index
    %c0_42 = arith.constant 0 : index
    %66 = vector.load %arg13[%c0_41, %c0_42] : memref<1x32xf32, #tpu.memory_space<vmem>>, vector<1x32xf32>
    %67 = vector.broadcast %66 : vector<1x32xf32> to vector<8x32xf32>
    %68 = arith.addf %65, %67 : vector<8x32xf32>
    %69 = arith.addf %4, %68 : vector<8x32xf32>
    %c0_43 = arith.constant 0 : index
    %c0_44 = arith.constant 0 : index
    %70 = vector.load %arg14[%c0_43, %c0_44] : memref<1x32xf32, #tpu.memory_space<vmem>>, vector<1x32xf32>
    %c0_45 = arith.constant 0 : index
    %c0_46 = arith.constant 0 : index
    %71 = vector.load %arg15[%c0_45, %c0_46] : memref<1x32xf32, #tpu.memory_space<vmem>>, vector<1x32xf32>
    %cst_47 = arith.constant dense<0.000000e+00> : vector<8xf32>
    %72 = vector.multi_reduction <add>, %69, %cst_47 [1] : vector<8x32xf32> to vector<8xf32>
    %73 = vector.shape_cast %72 : vector<8xf32> to vector<8x1xf32>
    %74 = arith.mulf %69, %69 : vector<8x32xf32>
    %cst_48 = arith.constant dense<0.000000e+00> : vector<8xf32>
    %75 = vector.multi_reduction <add>, %74, %cst_48 [1] : vector<8x32xf32> to vector<8xf32>
    %76 = vector.shape_cast %75 : vector<8xf32> to vector<8x1xf32>
    %cst_49 = arith.constant 3.125000e-02 : f32
    %77 = vector.broadcast %cst_49 : f32 to vector<8x1xf32>
    %78 = arith.mulf %73, %77 : vector<8x1xf32>
    %cst_50 = arith.constant 3.125000e-02 : f32
    %79 = vector.broadcast %cst_50 : f32 to vector<8x1xf32>
    %80 = arith.mulf %76, %79 : vector<8x1xf32>
    %81 = arith.mulf %78, %78 : vector<8x1xf32>
    %82 = arith.subf %80, %81 : vector<8x1xf32>
    %83 = vector.broadcast %78 : vector<8x1xf32> to vector<8x32xf32>
    %84 = arith.subf %69, %83 : vector<8x32xf32>
    %cst_51 = arith.constant 9.99999974E-6 : f32
    %85 = vector.broadcast %cst_51 : f32 to vector<8x1xf32>
    %86 = arith.addf %82, %85 : vector<8x1xf32>
    %87 = math.rsqrt %86 : vector<8x1xf32>
    %88 = vector.broadcast %87 : vector<8x1xf32> to vector<8x32xf32>
    %89 = arith.mulf %84, %88 : vector<8x32xf32>
    %90 = vector.broadcast %70 : vector<1x32xf32> to vector<8x32xf32>
    %91 = arith.mulf %89, %90 : vector<8x32xf32>
    %92 = vector.broadcast %71 : vector<1x32xf32> to vector<8x32xf32>
    %93 = arith.addf %91, %92 : vector<8x32xf32>
    %94 = arith.addf %1, %93 : vector<8x32xf32>
    %c0_52 = arith.constant 0 : index
    %c0_53 = arith.constant 0 : index
    %95 = vector.load %arg16[%c0_52, %c0_53] : memref<1x32xf32, #tpu.memory_space<vmem>>, vector<1x32xf32>
    %c0_54 = arith.constant 0 : index
    %c0_55 = arith.constant 0 : index
    %96 = vector.load %arg17[%c0_54, %c0_55] : memref<1x32xf32, #tpu.memory_space<vmem>>, vector<1x32xf32>
    %cst_56 = arith.constant dense<0.000000e+00> : vector<8xf32>
    %97 = vector.multi_reduction <add>, %94, %cst_56 [1] : vector<8x32xf32> to vector<8xf32>
    %98 = vector.shape_cast %97 : vector<8xf32> to vector<8x1xf32>
    %99 = arith.mulf %94, %94 : vector<8x32xf32>
    %cst_57 = arith.constant dense<0.000000e+00> : vector<8xf32>
    %100 = vector.multi_reduction <add>, %99, %cst_57 [1] : vector<8x32xf32> to vector<8xf32>
    %101 = vector.shape_cast %100 : vector<8xf32> to vector<8x1xf32>
    %cst_58 = arith.constant 3.125000e-02 : f32
    %102 = vector.broadcast %cst_58 : f32 to vector<8x1xf32>
    %103 = arith.mulf %98, %102 : vector<8x1xf32>
    %cst_59 = arith.constant 3.125000e-02 : f32
    %104 = vector.broadcast %cst_59 : f32 to vector<8x1xf32>
    %105 = arith.mulf %101, %104 : vector<8x1xf32>
    %106 = arith.mulf %103, %103 : vector<8x1xf32>
    %107 = arith.subf %105, %106 : vector<8x1xf32>
    %108 = vector.broadcast %103 : vector<8x1xf32> to vector<8x32xf32>
    %109 = arith.subf %94, %108 : vector<8x32xf32>
    %cst_60 = arith.constant 9.99999974E-6 : f32
    %110 = vector.broadcast %cst_60 : f32 to vector<8x1xf32>
    %111 = arith.addf %107, %110 : vector<8x1xf32>
    %112 = math.rsqrt %111 : vector<8x1xf32>
    %113 = vector.broadcast %112 : vector<8x1xf32> to vector<8x32xf32>
    %114 = arith.mulf %109, %113 : vector<8x32xf32>
    %115 = vector.broadcast %95 : vector<1x32xf32> to vector<8x32xf32>
    %116 = arith.mulf %114, %115 : vector<8x32xf32>
    %117 = vector.broadcast %96 : vector<1x32xf32> to vector<8x32xf32>
    %118 = arith.addf %116, %117 : vector<8x32xf32>
    %c0_61 = arith.constant 0 : index
    %c0_62 = arith.constant 0 : index
    %119 = vector.load %arg18[%c0_61, %c0_62] : memref<32x64xf32, #tpu.memory_space<vmem>>, vector<32x64xf32>
    %cst_63 = arith.constant dense<0.000000e+00> : vector<8x64xf32>
    %120 = tpu.matmul %118, %119, %cst_63 {dimension_numbers = #tpu.dot_dimension_numbers<[1], [0], [0], [1], [0, 0, 1, 1], [], []>} : vector<8x32xf32>, vector<32x64xf32>, vector<8x64xf32> -> vector<8x64xf32>
    %c0_64 = arith.constant 0 : index
    %c0_65 = arith.constant 0 : index
    %121 = vector.load %arg19[%c0_64, %c0_65] : memref<1x64xf32, #tpu.memory_space<vmem>>, vector<1x64xf32>
    %122 = vector.broadcast %121 : vector<1x64xf32> to vector<8x64xf32>
    %123 = arith.addf %120, %122 : vector<8x64xf32>
    %cst_66 = arith.constant 0.000000e+00 : f32
    %124 = vector.broadcast %cst_66 : f32 to vector<8x64xf32>
    %125 = arith.maximumf %123, %124 : vector<8x64xf32>
    %c0_67 = arith.constant 0 : index
    %c0_68 = arith.constant 0 : index
    %126 = vector.load %arg20[%c0_67, %c0_68] : memref<64x32xf32, #tpu.memory_space<vmem>>, vector<64x32xf32>
    %cst_69 = arith.constant dense<0.000000e+00> : vector<8x32xf32>
    %127 = tpu.matmul %125, %126, %cst_69 {dimension_numbers = #tpu.dot_dimension_numbers<[1], [0], [0], [1], [0, 0, 1, 1], [], []>} : vector<8x64xf32>, vector<64x32xf32>, vector<8x32xf32> -> vector<8x32xf32>
    %c0_70 = arith.constant 0 : index
    %c0_71 = arith.constant 0 : index
    %128 = vector.load %arg21[%c0_70, %c0_71] : memref<1x32xf32, #tpu.memory_space<vmem>>, vector<1x32xf32>
    %129 = vector.broadcast %128 : vector<1x32xf32> to vector<8x32xf32>
    %130 = arith.addf %127, %129 : vector<8x32xf32>
    %131 = arith.addf %118, %130 : vector<8x32xf32>
    %c0_72 = arith.constant 0 : index
    %c0_73 = arith.constant 0 : index
    %132 = vector.load %arg22[%c0_72, %c0_73] : memref<1x32xf32, #tpu.memory_space<vmem>>, vector<1x32xf32>
    %c0_74 = arith.constant 0 : index
    %c0_75 = arith.constant 0 : index
    %133 = vector.load %arg23[%c0_74, %c0_75] : memref<1x32xf32, #tpu.memory_space<vmem>>, vector<1x32xf32>
    %cst_76 = arith.constant dense<0.000000e+00> : vector<8xf32>
    %134 = vector.multi_reduction <add>, %131, %cst_76 [1] : vector<8x32xf32> to vector<8xf32>
    %135 = vector.shape_cast %134 : vector<8xf32> to vector<8x1xf32>
    %136 = arith.mulf %131, %131 : vector<8x32xf32>
    %cst_77 = arith.constant dense<0.000000e+00> : vector<8xf32>
    %137 = vector.multi_reduction <add>, %136, %cst_77 [1] : vector<8x32xf32> to vector<8xf32>
    %138 = vector.shape_cast %137 : vector<8xf32> to vector<8x1xf32>
    %cst_78 = arith.constant 3.125000e-02 : f32
    %139 = vector.broadcast %cst_78 : f32 to vector<8x1xf32>
    %140 = arith.mulf %135, %139 : vector<8x1xf32>
    %cst_79 = arith.constant 3.125000e-02 : f32
    %141 = vector.broadcast %cst_79 : f32 to vector<8x1xf32>
    %142 = arith.mulf %138, %141 : vector<8x1xf32>
    %143 = arith.mulf %140, %140 : vector<8x1xf32>
    %144 = arith.subf %142, %143 : vector<8x1xf32>
    %145 = vector.broadcast %140 : vector<8x1xf32> to vector<8x32xf32>
    %146 = arith.subf %131, %145 : vector<8x32xf32>
    %cst_80 = arith.constant 9.99999974E-6 : f32
    %147 = vector.broadcast %cst_80 : f32 to vector<8x1xf32>
    %148 = arith.addf %144, %147 : vector<8x1xf32>
    %149 = math.rsqrt %148 : vector<8x1xf32>
    %150 = vector.broadcast %149 : vector<8x1xf32> to vector<8x32xf32>
    %151 = arith.mulf %146, %150 : vector<8x32xf32>
    %152 = vector.broadcast %132 : vector<1x32xf32> to vector<8x32xf32>
    %153 = arith.mulf %151, %152 : vector<8x32xf32>
    %154 = vector.broadcast %133 : vector<1x32xf32> to vector<8x32xf32>
    %155 = arith.addf %153, %154 : vector<8x32xf32>
    %c0_81 = arith.constant 0 : index
    %c0_82 = arith.constant 0 : index
    %c0_83 = arith.constant 0 : index
    %156 = vector.load %arg24[%c0_81, %c0_82, %c0_83] : memref<1x8x32xf32, #tpu.memory_space<vmem>>, vector<1x8x32xf32>
    %157 = vector.shape_cast %156 : vector<1x8x32xf32> to vector<8x32xf32>
    %158 = vector.shape_cast %155 : vector<8x32xf32> to vector<1x8x32xf32>
    tpu.vector_store %arg24[%c0_81, %c0_82, %c0_83], %158 {strides = array<i32>} : memref<1x8x32xf32, #tpu.memory_space<vmem>>, vector<1x8x32xf32>,
    return
  }
  func.func @transform_0(%arg0: i32) -> (i32, i32, i32) {
    %c0_i32 = arith.constant 0 : i32
    %c0_i32_0 = arith.constant 0 : i32
    %c0_i32_1 = arith.constant 0 : i32
    return %arg0, %c0_i32, %c0_i32_0 : i32, i32, i32
  }
  func.func @transform_1(%arg0: i32) -> (i32, i32, i32) {
    %c0_i32 = arith.constant 0 : i32
    %c0_i32_0 = arith.constant 0 : i32
    %c0_i32_1 = arith.constant 0 : i32
    return %arg0, %c0_i32, %c0_i32_0 : i32, i32, i32
  }
  func.func @transform_2(%arg0: i32) -> (i32, i32, i32) {
    %c0_i32 = arith.constant 0 : i32
    %c0_i32_0 = arith.constant 0 : i32
    %c0_i32_1 = arith.constant 0 : i32
    return %arg0, %c0_i32, %c0_i32_0 : i32, i32, i32
  }
  func.func @transform_3(%arg0: i32) -> (i32, i32, i32) {
    %c0_i32 = arith.constant 0 : i32
    %c0_i32_0 = arith.constant 0 : i32
    %c0_i32_1 = arith.constant 0 : i32
    return %arg0, %c0_i32, %c0_i32_0 : i32, i32, i32
  }
  func.func @transform_4(%arg0: i32) -> (i32, i32, i32) {
    %c0_i32 = arith.constant 0 : i32
    %c0_i32_0 = arith.constant 0 : i32
    %c0_i32_1 = arith.constant 0 : i32
    return %arg0, %c0_i32, %c0_i32_0 : i32, i32, i32
  }
  func.func @transform_5(%arg0: i32) -> (i32, i32) {
    %c0_i32 = arith.constant 0 : i32
    %c0_i32_0 = arith.constant 0 : i32
    %c0_i32_1 = arith.constant 0 : i32
    return %c0_i32, %c0_i32_0 : i32, i32
  }
  func.func @transform_6(%arg0: i32) -> (i32, i32) {
    %c0_i32 = arith.constant 0 : i32
    %c0_i32_0 = arith.constant 0 : i32
    %c0_i32_1 = arith.constant 0 : i32
    return %c0_i32, %c0_i32_0 : i32, i32
  }
  func.func @transform_7(%arg0: i32) -> (i32, i32) {
    %c0_i32 = arith.constant 0 : i32
    %c0_i32_0 = arith.constant 0 : i32
    %c0_i32_1 = arith.constant 0 : i32
    return %c0_i32, %c0_i32_0 : i32, i32
  }
  func.func @transform_8(%arg0: i32) -> (i32, i32) {
    %c0_i32 = arith.constant 0 : i32
    %c0_i32_0 = arith.constant 0 : i32
    %c0_i32_1 = arith.constant 0 : i32
    return %c0_i32, %c0_i32_0 : i32, i32
  }
  func.func @transform_9(%arg0: i32) -> (i32, i32) {
    %c0_i32 = arith.constant 0 : i32
    %c0_i32_0 = arith.constant 0 : i32
    %c0_i32_1 = arith.constant 0 : i32
    return %c0_i32, %c0_i32_0 : i32, i32
  }
  func.func @transform_10(%arg0: i32) -> (i32, i32) {
    %c0_i32 = arith.constant 0 : i32
    %c0_i32_0 = arith.constant 0 : i32
    %c0_i32_1 = arith.constant 0 : i32
    return %c0_i32, %c0_i32_0 : i32, i32
  }
  func.func @transform_11(%arg0: i32) -> (i32, i32) {
    %c0_i32 = arith.constant 0 : i32
    %c0_i32_0 = arith.constant 0 : i32
    %c0_i32_1 = arith.constant 0 : i32
    return %c0_i32, %c0_i32_0 : i32, i32
  }
  func.func @transform_12(%arg0: i32) -> (i32, i32) {
    %c0_i32 = arith.constant 0 : i32
    %c0_i32_0 = arith.constant 0 : i32
    %c0_i32_1 = arith.constant 0 : i32
    return %c0_i32, %c0_i32_0 : i32, i32
  }
  func.func @transform_13(%arg0: i32) -> (i32, i32) {
    %c0_i32 = arith.constant 0 : i32
    %c0_i32_0 = arith.constant 0 : i32
    %c0_i32_1 = arith.constant 0 : i32
    return %c0_i32, %c0_i32_0 : i32, i32
  }
  func.func @transform_14(%arg0: i32) -> (i32, i32) {
    %c0_i32 = arith.constant 0 : i32
    %c0_i32_0 = arith.constant 0 : i32
    %c0_i32_1 = arith.constant 0 : i32
    return %c0_i32, %c0_i32_0 : i32, i32
  }
  func.func @transform_15(%arg0: i32) -> (i32, i32) {
    %c0_i32 = arith.constant 0 : i32
    %c0_i32_0 = arith.constant 0 : i32
    %c0_i32_1 = arith.constant 0 : i32
    return %c0_i32, %c0_i32_0 : i32, i32
  }
  func.func @transform_16(%arg0: i32) -> (i32, i32) {
    %c0_i32 = arith.constant 0 : i32
    %c0_i32_0 = arith.constant 0 : i32
    %c0_i32_1 = arith.constant 0 : i32
    return %c0_i32, %c0_i32_0 : i32, i32
  }
  func.func @transform_17(%arg0: i32) -> (i32, i32) {
    %c0_i32 = arith.constant 0 : i32
    %c0_i32_0 = arith.constant 0 : i32
    %c0_i32_1 = arith.constant 0 : i32
    return %c0_i32, %c0_i32_0 : i32, i32
  }
  func.func @transform_18(%arg0: i32) -> (i32, i32) {
    %c0_i32 = arith.constant 0 : i32
    %c0_i32_0 = arith.constant 0 : i32
    %c0_i32_1 = arith.constant 0 : i32
    return %c0_i32, %c0_i32_0 : i32, i32
  }
  func.func @transform_19(%arg0: i32) -> (i32, i32) {
    %c0_i32 = arith.constant 0 : i32
    %c0_i32_0 = arith.constant 0 : i32
    %c0_i32_1 = arith.constant 0 : i32
    return %c0_i32, %c0_i32_0 : i32, i32
  }
  func.func @transform_20(%arg0: i32) -> (i32, i32) {
    %c0_i32 = arith.constant 0 : i32
    %c0_i32_0 = arith.constant 0 : i32
    %c0_i32_1 = arith.constant 0 : i32
    return %c0_i32, %c0_i32_0 : i32, i32
  }
  func.func @transform_21(%arg0: i32) -> (i32, i32) {
    %c0_i32 = arith.constant 0 : i32
    %c0_i32_0 = arith.constant 0 : i32
    %c0_i32_1 = arith.constant 0 : i32
    return %c0_i32, %c0_i32_0 : i32, i32
  }
  func.func @transform_22(%arg0: i32) -> (i32, i32) {
    %c0_i32 = arith.constant 0 : i32
    %c0_i32_0 = arith.constant 0 : i32
    %c0_i32_1 = arith.constant 0 : i32
    return %c0_i32, %c0_i32_0 : i32, i32
  }
  func.func @transform_23(%arg0: i32) -> (i32, i32, i32) {
    %c0_i32 = arith.constant 0 : i32
    %c0_i32_0 = arith.constant 0 : i32
    %c0_i32_1 = arith.constant 0 : i32
    return %arg0, %c0_i32, %c0_i32_0 : i32, i32, i32
  }
}

</mosaic_0001>

<bundles_post_ra>
// kernel: encoder_layer.1
= control target key start
LH: loop header
LB: loop body
LE: loop exit
PB: predicated region body
PF: predicated region fallthrough
CT: control target
= control target key end

     0   :  { %s3052_s0 = inlined_call_operand.vmem [shape: f32[2,8,32], index: 0, kind: input, shape index: {}]   ;;  %s3053_s1 = inlined_call_operand.vmem [shape: f32[2,8,32], index: 1, kind: input, shape index: {}]   ;;  %s3054_s2 = inlined_call_operand.vmem [shape: f32[2,8,32], index: 2, kind: input, shape index: {}]   ;;  %s3055_s3 = inlined_call_operand.vmem [shape: f32[2,8,32], index: 3, kind: input, shape index: {}]   ;;  %s3056_s4 = inlined_call_operand.vmem [shape: f32[2,32,8], index: 4, kind: input, shape index: {}]   ;;  %s3057_s5 = inlined_call_operand.vmem [shape: f32[32,32], index: 5, kind: input, shape index: {}]   ;;  %s3058_s6 = inlined_call_operand.vmem [shape: f32[1,32], index: 6, kind: input, shape index: {}]   ;;  %s3059_s7 = inlined_call_operand.vmem [shape: f32[32,32], index: 7, kind: input, shape index: {}]   ;;  %s3060_s8 = inlined_call_operand.vmem [shape: f32[1,32], index: 8, kind: input, shape index: {}]   ;;  %s3061_s9 = inlined_call_operand.vmem [shape: f32[32,32], index: 9, kind: input, shape index: {}]   ;;  %s3062_s10 = inlined_call_operand.vmem [shape: f32[1,32], index: 10, kind: input, shape index: {}]   ;;  %s3063_s11 = inlined_call_operand.vmem [shape: f32[32,32], index: 11, kind: input, shape index: {}]   ;;  %s3064_s12 = inlined_call_operand.vmem [shape: f32[1,32], index: 12, kind: input, shape index: {}]   ;;  %s3065_s13 = inlined_call_operand.vmem [shape: f32[1,32], index: 13, kind: input, shape index: {}]   ;;  %s3066_s14 = inlined_call_operand.vmem [shape: f32[1,32], index: 14, kind: input, shape index: {}]   ;;  %s3067_s15 = inlined_call_operand.vmem [shape: f32[1,32], index: 15, kind: input, shape index: {}]   ;;  %s3068_s16 = inlined_call_operand.vmem [shape: f32[1,32], index: 16, kind: input, shape index: {}]   ;;  %s3069_s17 = inlined_call_operand.vmem [shape: f32[32,64], index: 17, kind: input, shape index: {}]   ;;  %s3070_s18 = inlined_call_operand.vmem [shape: f32[1,64], index: 18, kind: input, shape index: {}]   ;;  %s3071_s19 = inlined_call_operand.vmem [shape: f32[64,32], index: 19, kind: input, shape index: {}]   ;;  %s3072_s20 = inlined_call_operand.vmem [shape: f32[1,32], index: 20, kind: input, shape index: {}]   ;;  %s3073_s21 = inlined_call_operand.vmem [shape: f32[1,32], index: 21, kind: input, shape index: {}]   ;;  %s3074_s22 = inlined_call_operand.vmem [shape: f32[1,32], index: 22, kind: input, shape index: {}]   ;;  %s3075_s23 = inlined_call_operand.hbm [shape: f32[2,8,32], index: 23, kind: output, shape index: {}]  }
   0x1   :  { %3087 = sst [smem:[#allocation11_spill]] %s3052_s0 }
   0x2   :  { %3088 = sst [smem:[#allocation12_spill]] %s3053_s1 }
   0x3   :  { %3089 = sst [smem:[#allocation13_spill]] %s3054_s2 }
   0x4   :  { %3090 = sst [smem:[#allocation14_spill]] %s3055_s3 }
   0x5   :  { %3091 = sst [smem:[#allocation15_spill]] %s3056_s4 }
   0x6   :  { %3092 = sst [smem:[#allocation16_spill]] %s3057_s5 }
   0x7   :  { %3093 = sst [smem:[#allocation17_spill]] %s3058_s6 }
   0x8   :  { %3094 = sst [smem:[#allocation18_spill]] %s3059_s7 }
   0x9   :  { %3095 = sst [smem:[#allocation19_spill]] %s3073_s21 }
   0xa   :  { %3096 = sst [smem:[#allocation20_spill]] %s3074_s22 }
   0xb   :  { %3097 = sst [smem:[#allocation21_spill]] %s3075_s23 }
   0xc   :  { %28 = vsyncpa [#allocation3], 0 }
   0xd   :  { %30 = vsyncpa [#allocation3 + $0x1], 0  ;;  %s2710_s4 = smov 0   ;;  %s2712_s30 = smov 0  }
   0xe   :  { %s2714_s24 = smov 0   ;;  %s2716_s25 = smov 0  }
   0xf LB: > { %3098 = sst [smem:[#allocation5_spill]] %s2566_s4  ;;  %s2731_s5 = sadd.s32 4294967295, %s2578_s25   ;;  %s2578_s25 = sphi %s2716_s25, %s3120_s25   ;;  %s2574_s24 = sphi %s2714_s24, %s3122_s24   ;;  %s2570_s30 = sphi %s2712_s30, %s3124_s30   ;;  %s2566_s4 = sphi %s2710_s4, %s3123_s4  }
  0x10   : > { %3099 = sst [smem:[#allocation6_spill]] %s2574_s24  ;;  %s2194_s1 = sadd.s32 4294967294, %s2578_s25  }
  0x11   : > { %3100 = sst [smem:[#allocation7_spill]] %s2578_s25  ;;  %s2735_s26 = sadd.s32 1, %s2578_s25  }
  0x12   : > { %3101 = sst [smem:[#allocation8_spill]] %s2735_s26  ;;  %s551_s2 = sadd.s32 1, %s2574_s24 }
  0x13   : > { %s548_s6 = ssub.s32 %s2578_s25, %s2735_s26  ;;  %p561_p0 = scmp.ne.s32.totalorder %s2574_s24, %s2570_s30 }
  0x14   : > { %p549_p1 = scmp.eq.s32.totalorder %s548_s6, 0  ;;  %p562_p2 = scmp.eq.s32.totalorder %s2731_s5, 1 }
  0x15   : > { %p567_p3 = scmp.ne.s32.totalorder %s2570_s30, %s2566_s4  ;;  %p568_p4 = scmp.eq.s32.totalorder %s2194_s1, 1 }
  0x16   : > { %s2746_s27 = scalar_select %p549_p1, %s2574_s24, %s551_s2  }
  0x17   : > { %p2748_p5 = por %p562_p2, %p561_p0  ;;  %p2752_p6 = por %p568_p4, %p567_p3 }
  0x18   : > { %3102 = sst [smem:[#allocation9_spill]] %s2746_s27  ;;  %p2197_p7 = scmp.ge.s32.totalorder %s2578_s25, 1 }
  0x19   : > { %s3104_s28 = scalar_select %p2752_p6, 1, 0 }
  0x1a   : > { %p676_p8 = scmp.lt.s32.totalorder %s2578_s25, 3 }
  0x1b   : > { %3105 = sst [smem:[#allocation10_spill]] %s3104_s28 }
  0x1c   : > { %p677_p9 = pnand %p2197_p7, %p676_p8 }
  0x1d   : > { %s3106_s0 = sld [smem:[#allocation16_spill]] (!%p677_p9)  ;;  %v2580_v3 = vmov (!%p677_p9), 0.0|0.0   ;;  %vm2581_vm0 = vmmov (!%p677_p9), 0   ;;  %v2582_v6 = vmov (!%p677_p9), 0.0   ;;  %p756_p10 = scmp.lt.s32.totalorder (!%p677_p9), %s2731_s5, 1  ;;  %vm794_vm1 = vcmask (!%p677_p9), 261120  }
  0x1e   : > { %680 = sbr.rel (%p677_p9) target bundleno = 2421 (0x975), region = 112  ;;  %2404 = vmatprep.subr.bf16.mxu1 (!%p677_p9), %v2580_v3  ;;  %2298 = vmatprep.mubr.msk.f32.mxu1 (!%p677_p9), %vm2581_vm0, %v2582_v6  ;;  %s3107_s3 = sld [smem:[#allocation18_spill]] (!%p677_p9)  ;;  %v952_v19 = vld [vmem:[%s3061_s9] sm:$0xff] (!%p677_p9)  ;;  %v953_v20 = vld [vmem:[%s3061_s9 + $0x8] sm:$0xff] (!%p677_p9)  ;;  %v954_v21 = vld [vmem:[%s3061_s9 + $0x10] sm:$0xff] (!%p677_p9)  ;;  %vm1036_vm2 = vcmask (!%p677_p9), 64512  }
  0x1f   : > { %2416 = vmatprep.subr.bf16.mxu0 (!%p677_p9), %v2580_v3  ;;  %2320 = vmatprep.mubr.msk.f32.mxu0 (!%p677_p9), %vm2581_vm0, %v2582_v6  ;;  %s3108_s28 = sld [smem:[#allocation11_spill]] (!%p677_p9)  ;;  %s3109_s22 = sld [smem:[#allocation14_spill]] (!%p677_p9)  ;;  %v2417_v22 = vpack.c.bf16 (!%p677_p9), %v953_v20, %v952_v19  ;;  %v955_v23 = vld [vmem:[%s3061_s9 + $0x18] sm:$0xff] (!%p677_p9)  ;;  %v2207_v28 = vld [vmem:[%s3060_s8] ss:$0 sm:$0xff] (!%p677_p9)  ;;  %vm1714_vm3 = vcmask (!%p677_p9), 130048  }
  0x20   : > { %s3110_s1 = sld [smem:[#allocation12_spill]] (!%p677_p9)  ;;  %v2420_v24 = vpack.c.bf16 (!%p677_p9), %v955_v23, %v954_v21  ;;  %s3111_s23 = sld [smem:[#allocation13_spill]] (!%p677_p9)  ;;  %v2209_v40 = vld [vmem:[%s3062_s10] ss:$0 sm:$0xff] (!%p677_p9)  ;;  %vm1716_vm4 = vcmask (!%p677_p9), 195584   ;;  %vm1966_vm5 = vcmask (!%p677_p9), 523264  }
  0x21   : > { %2418 = vmatpush3.bf16.msra.mxu0 (!%p677_p9), %v2417_v22  ;;  %s3112_s26 = sld [smem:[#allocation17_spill]] (!%p677_p9)  ;;  %s2584_s29 = smov (!%p677_p9), 120  }
  0x22   : > { %2419 = vmatprep.subr.bf16.mxu0 (!%p677_p9), %v2580_v3  ;;  %s2236_s25 = sshll.u32 (!%p677_p9), %s2731_s5, 7 }
  0x23   : > { %v783_v0 = vld [vmem:[%s3106_s0] sm:$0xff] (!%p677_p9)  ;;  %v784_v1 = vld [vmem:[%s3106_s0 + $0x8] sm:$0xff] (!%p677_p9)  ;;  %v785_v2 = vld [vmem:[%s3106_s0 + $0x10] sm:$0xff] (!%p677_p9) }
  0x24   : > { %v2405_v4 = vpack.c.bf16 (!%p677_p9), %v784_v1, %v783_v0  ;;  %v786_v5 = vld [vmem:[%s3106_s0 + $0x18] sm:$0xff] (!%p677_p9)  ;;  %v868_v8 = vld [vmem:[%s3107_s3] sm:$0xff] (!%p677_p9)  ;;  %v869_v9 = vld [vmem:[%s3107_s3 + $0x8] sm:$0xff] (!%p677_p9) }
  0x25   : > { %v2408_v7 = vpack.c.bf16 %v786_v5, %v785_v2  ;;  %s2778_s27 = scalar_select %p756_p10, %s2731_s5, 1  ;;  %v2411_v12 = vpack.c.bf16 %v869_v9, %v868_v8  ;;  %v870_v14 = vld [vmem:[%s3107_s3 + $0x10] sm:$0xff]  ;;  %v871_v15 = vld [vmem:[%s3107_s3 + $0x18] sm:$0xff]  ;;  %2421 = vmatpush3.bf16.msra.mxu0 %v2420_v24 }
  0x26   : > { %2406 = vmatpush3.bf16.msra.mxu1 %v2405_v4  ;;  %v2414_v17 = vpack.c.bf16 %v871_v15, %v870_v14  ;;  %2333 = vmatprep.subr.mxu0 %v2582_v6  ;;  %s2589_s5 = smov [#allocation2]  }
  0x27   : > { %2407 = vmatprep.subr.bf16.mxu1 %v2580_v3  ;;  %s2782_s24 = sshll.u32 %s2778_s27, 3  ;;  %v2205_v32 = vld [vmem:[%s3112_s26] ss:$0 sm:$0xff]  ;;  %s2239_s0 = sshll.u32 %s2778_s27, 5 }
  0x28   : > { %s759_s4 = scalar_lea.vmem %s3108_s28, %s2782_s24  ;;  %s771_s21 = scalar_lea.vmem %s3109_s22, %s2782_s24 }
  0x29   : > { %v2798_v10 = vld [vmem:[%s759_s4] sm:$0xff]  ;;  %s763_s2 = scalar_lea.vmem %s3110_s1, %s2782_s24  ;;  %s767_s22 = scalar_lea.vmem %s3111_s23, %s2782_s24 }
  0x2a   : > { %2409 = vmatpush3.bf16.msra.mxu1 %v2408_v7  ;;  %v778_v11 = vld [vmem:[%s771_s21] sm:$0xff]  ;;  %s2583_s24 = smov 112   ;;  %s2585_s1 = smov 104  }
  0x2b   : > { %2410 = vmatprep.subr.bf16.mxu1 %v2580_v3  ;;  %v2806_v13 = vadd.f32 %v778_v11, %v2798_v10  ;;  %v780_v16 = vld [vmem:[%s763_s2] sm:$0xff]  ;;  %s3113_s21 = sld [smem:[#allocation15_spill]]  ;;  %s2586_s28 = smov 8  }
  0x2c   : > { %v781_v18 = vadd.f32 %v780_v16, %v778_v11  ;;  %v782_v25 = vld [vmem:[%s767_s22] sm:$0xff]  ;;  %s2588_s23 = smov 24   ;;  %s753_s2 = sand.u32 1, %s2570_s30  }
  0x2d   : > { %2299 = vmatmul.mubr.msk.f32.vlgmr.msra.gmra.mrb[0].mxu1 %vm794_vm1, %v2806_v13  ;;  %2321 = vmatmul.mubr.msk.f32.vlgmr.msra.gmra.mrb[0].mxu0 %vm794_vm1, %v782_v25  ;;  %s3114_s22 = sld [smem:[#allocation19_spill]]  ;;  %s3115_s27 = sld [smem:[#allocation20_spill]] }
  0x2e   : > { %2412 = vmatpush3.bf16.msra.mxu1 %v2411_v12  ;;  %2309 = vmatprep.mubr.msk.f32.mxu1 %vm2581_vm0, %v2582_v6 }
  0x2f   : > { %2413 = vmatprep.subr.bf16.mxu1 %v2580_v3  ;;  %2335 = vmatprep.mubr.msk.f32.mxu0 %vm2581_vm0, %v2582_v6 }
  0x31   : > { %s776_s4 = scalar_lea.vmem %s3113_s21, %s2239_s0  ;;  %s2587_s0 = smov 16  }
  0x32   : > { %2415 = vmatpush3.bf16.msra.mxu1 %v2414_v17  ;;  %v1347_v44 = vld [vmem:[%s776_s4] sm:$0xff]  ;;  %v1348_v49 = vld [vmem:[%s776_s4 + $0x8] sm:$0xff]  ;;  %v1349_v53 = vld [vmem:[%s776_s4 + $0x10] sm:$0xff] }
  0x33   : > { %2323 = vmatprep.subr.mxu1 %v2582_v6  ;;  %v1350_v57 = vld [vmem:[%s776_s4 + $0x18] sm:$0xff] }
  0x35   : > { %2310 = vmatmul.mubr.msk.f32.vlgmr.msra.gmra.mrb[2].mxu1 %vm794_vm1, %v781_v18 }
  0x36   : > { %2325 = vmatprep.mubr.msk.f32.mxu1 %vm2581_vm0, %v2582_v6 }
 0x100   : > { %v864_v26 = vpop.f32.mrb[0].mxu1  ;;  %v1032_v41 = vpop.f32.mrb[0].mxu0 }
 0x101   : > { %v2300_v27 = vpop.f32.mrb[1].mxu1  ;;  %v865_v33 = vadd.f32 %v2205_v32, %v864_v26  ;;  %v1033_v42 = vadd.f32 %v2209_v40, %v1032_v41  ;;  %v2322_v43 = vpop.f32.mrb[1].mxu0  ;;  %v1718_v41 = vld [vmem:[%s3063_s11] sm:$0xff] }
 0x108   : > { %v948_v29 = vpop.f32.mrb[2].mxu1 }
 0x109   : > { %v949_v30 = vadd.f32 %v2207_v28, %v948_v29  ;;  %v2311_v31 = vpop.f32.mrb[3].mxu1 }
 0x10b   : > { %1193 = vrot.lane.b32.xlu1 %v949_v30, %s2583_s24  ;;  %1115 = vrot.lane.b32.xlu0 %v949_v30, %s2584_s29 }
 0x10c   : > { %2324 = vmatpush3.xpose.msk.msra.mxu1 %vm1036_vm2, %v949_v30 }
 0x10d   : > { %2328 = vmatprep.subr.mxu1 %v2582_v6 }
 0x10f   : > { %2326 = vmatmul.mubr.msk.f32.vlgmr.msra.gmra.mrb[4].mxu1 %vm1036_vm2, %v865_v33  ;;  %1271 = vrot.lane.b32.xlu1 %v949_v30, %s2585_s1 }
 0x110   : > { %1113 = vrot.lane.b32.xlu0 %v865_v33, %s2584_s29  ;;  %2330 = vmatprep.mubr.msk.f32.mxu1 %vm2581_vm0, %v2582_v6 }
 0x113   : > { %1269 = vrot.lane.b32.xlu1 %v865_v33, %s2585_s1 }
 0x114   : > { %1191 = vrot.lane.b32.xlu0 %v865_v33, %s2583_s24 }
 0x17d   : > { %v1194_v34 = vpop.permute.xlu1 %1193  ;;  %v1116_v35 = vpop.permute.xlu0 %1115 }
 0x17e   : > { %2329 = vmatpush3.xpose.msk.msra.mxu1 %vm1036_vm2, %v1116_v35  ;;  %2334 = vmatpush3.xpose.msk.msra.mxu0 %vm1036_vm2, %v1194_v34 }
 0x17f   : > { %2338 = vmatprep.subr.mxu1 %v2582_v6  ;;  %2343 = vmatprep.subr.mxu0 %v2582_v6 }
 0x181   : > { %v1272_v36 = vpop.permute.xlu1 %1271 }
 0x182   : > { %v1114_v37 = vpop.permute.xlu0 %1113 }
 0x183   : > { %2331 = vmatmul.mubr.msk.f32.vlgmr.msra.gmra.mrb[6].mxu1 %vm1036_vm2, %v1114_v37 }
 0x184   : > { %2339 = vmatpush3.xpose.msk.msra.mxu1 %vm1036_vm2, %v1272_v36  ;;  %2340 = vmatprep.mubr.msk.f32.mxu1 %vm2581_vm0, %v2582_v6 }
 0x185   : > { %v1270_v38 = vpop.permute.xlu1 %1269  ;;  %2348 = vmatprep.subr.mxu1 %v2582_v6 }
 0x186   : > { %v1192_v39 = vpop.permute.xlu0 %1191 }
 0x187   : > { %2336 = vmatmul.mubr.msk.f32.vlgmr.msra.gmra.mrb[2].mxu0 %vm1036_vm2, %v1192_v39  ;;  %2341 = vmatmul.mubr.msk.f32.vlgmr.msra.gmra.mrb[8].mxu1 %vm1036_vm2, %v1270_v38 }
 0x188   : > { %2345 = vmatprep.mubr.msk.f32.mxu0 %vm2581_vm0, %v2582_v6  ;;  %2350 = vmatprep.mubr.msk.f32.mxu1 %vm2581_vm0, %v2582_v6 }
 0x189   : > { %2344 = vmatpush3.msra.mxu0 %v1033_v42 }
 0x18a   : > { %2353 = vmatprep.subr.mxu0 %v2582_v6 }
 0x1e2   : > { %v1109_v45 = vpop.f32.mrb[4].mxu1 }
 0x1e3   : > { %v1351_v46 = vadd.f32 %v1347_v44, %v1109_v45  ;;  %v2327_v47 = vpop.f32.mrb[5].mxu1  ;;  %v1720_v44 = vld [vmem:[%s3063_s11 + $0x10] sm:$0xff]  ;;  %v1721_v45 = vld [vmem:[%s3063_s11 + $0x18] sm:$0xff] }
 0x1e5   : > { %v1355_v48 = vsel %vm1036_vm2, %v1351_v46, -inf }
 0x1e6   : > { %1356 = vmax.xlane.f32.xlu0 %v1355_v48 }
 0x256   : > { %v1187_v50 = vpop.f32.mrb[6].mxu1 }
 0x257   : > { %v1352_v51 = vadd.f32 %v1348_v49, %v1187_v50  ;;  %v2332_v52 = vpop.f32.mrb[7].mxu1 }
 0x259   : > { %v1358_v54 = vsel %vm1036_vm2, %v1352_v51, -inf }
 0x25a   : > { %v1265_v55 = vpop.f32.mrb[2].mxu0  ;;  %1359 = vmax.xlane.f32.xlu1 %v1358_v54  ;;  %v1343_v56 = vpop.f32.mrb[8].mxu1 }
 0x25b   : > { %v1353_v58 = vadd.f32 %v1349_v53, %v1265_v55  ;;  %v2337_v59 = vpop.f32.mrb[3].mxu0  ;;  %v2342_v60 = vpop.f32.mrb[9].mxu1  ;;  %v1354_v61 = vadd.f32 %v1350_v57, %v1343_v56 }
 0x25c   : > { %v2223_v59 = vld [vmem:[%s3064_s12] ss:$0 sm:$0xff] }
 0x25d   : > { %v1361_v62 = vsel %vm1036_vm2, %v1353_v58, -inf  ;;  %v1364_v63 = vsel %vm1036_vm2, %v1354_v61, -inf }
 0x25e   : > { %1362 = vmax.xlane.f32.xlu0 %v1361_v62 }
 0x262   : > { %1365 = vmax.xlane.f32.xlu0 %v1364_v63 }
 0x26b   : > { %1473 = vrot.lane.b32.xlu1 %v1033_v42, %s2584_s29 }
 0x273   : > { %v1357_v0 = vpop.xlane.xlu0 %1356 }
 0x274   : > { %v1367_v1 = vsub.f32 %v1351_v46, %v1357_v0  ;;  %v2426_v46 = vpack.c.bf16 %v1721_v45, %v1720_v44 }
 0x276   : > { %v1371_v2 = vmul.f32 1.442695, %v1367_v1 }
 0x278   : > { %2494 = vpow2.f32 %v1371_v2 }
 0x282   : > { %v2495_v4 = vpop.eup %2494 }
 0x283   : > { %v1379_v5 = vsel %vm1036_vm2, %v2495_v4, 0.0 }
 0x28f   : > { %1380 = vadd.xlane.f32.xlu1 %v1379_v5 }
 0x2e7   : > { %v1360_v7 = vpop.xlane.xlu1 %1359 }
 0x2e8   : > { %v1368_v8 = vsub.f32 %v1352_v51, %v1360_v7 }
 0x2ea   : > { %v1373_v9 = vmul.f32 1.442695, %v1368_v8 }
 0x2eb   : > { %v1363_v11 = vpop.xlane.xlu0 %1362  ;;  %v1474_v12 = vpop.permute.xlu1 %1473 }
 0x2ec   : > { %2496 = vpow2.f32 %v1373_v9  ;;  %v1369_v14 = vsub.f32 %v1353_v58, %v1363_v11  ;;  %2349 = vmatpush3.msra.mxu1 %v1474_v12 }
 0x2ed   : > { %2358 = vmatprep.subr.mxu1 %v2582_v6 }
 0x2ee   : > { %v1375_v15 = vmul.f32 1.442695, %v1369_v14 }
 0x2ef   : > { %v1366_v16 = vpop.xlane.xlu0 %1365 }
 0x2f0   : > { %2498 = vpow2.f32 %v1375_v15  ;;  %v1370_v17 = vsub.f32 %v1354_v61, %v1366_v16  ;;  %v2226_v16 = vld [vmem:[%s3066_s14] ss:$0 sm:$0xff] }
 0x2f2   : > { %v1377_v18 = vmul.f32 1.442695, %v1370_v17 }
 0x2f4   : > { %2500 = vpow2.f32 %v1377_v18 }
 0x2f6   : > { %v2497_v19 = vpop.eup %2496 }
 0x2f7   : > { %v1382_v20 = vsel %vm1036_vm2, %v2497_v19, 0.0 }
 0x2f8   : > { %1383 = vadd.xlane.f32.xlu0 %v1382_v20 }
 0x2fa   : > { %v2499_v21 = vpop.eup %2498 }
 0x2fb   : > { %v1385_v22 = vsel %vm1036_vm2, %v2499_v21, 0.0 }
 0x2fc   : > { %1386 = vadd.xlane.f32.xlu1 %v1385_v22 }
 0x2fe   : > { %v2501_v23 = vpop.eup %2500 }
 0x2ff   : > { %v1388_v24 = vsel %vm1036_vm2, %v2501_v23, 0.0 }
 0x300   : > { %1389 = vadd.xlane.f32.xlu0 %v1388_v24  ;;  %v1867_v24 = vld [vmem:[%s3069_s17 + $0x8] sm:$0xff] }
 0x30d   : > { %1625 = vrot.lane.b32.xlu1 %v1033_v42, %s2585_s1  ;;  %s3116_s1 = sld [smem:[#allocation21_spill]] }
 0x313   : > { %s3009_s3 = scalar_lea.hbm %s3116_s1, %s2236_s25 }
 0x316   : > { %1549 = vrot.lane.b32.xlu0 %v1033_v42, %s2583_s24  ;;  %v1719_v42 = vld [vmem:[%s3063_s11 + $0x8] sm:$0xff] }
 0x317   : > { %v2423_v43 = vpack.c.bf16 %v1719_v42, %v1718_v41 }
 0x31c   : > { %v1381_v25 = vpop.xlane.xlu1 %1380 }
 0x31d   : > { %2502 = vrcp.f32 %v1381_v25 }
 0x327   : > { %v2503_v26 = vpop.eup %2502 }
 0x328   : > { %v1395_v27 = vmul.f32 %v2503_v26, %v2495_v4  ;;  %v1869_v26 = vld [vmem:[%s3069_s17 + $0x18] sm:$0xff] }
 0x32a   : > { %2346 = vmatmul.mubr.msk.f32.vlgmr.msra.gmra.mrb[4].mxu0 %vm1036_vm2, %v1395_v27 }
 0x32b   : > { %2355 = vmatprep.mubr.msk.f32.mxu0 %vm2581_vm0, %v2582_v6 }
 0x385   : > { %v1384_v28 = vpop.xlane.xlu0 %1383 }
 0x386   : > { %2504 = vrcp.f32 %v1384_v28  ;;  %v1951_v28 = vld [vmem:[%s3071_s19] sm:$0xff] }
 0x389   : > { %v1387_v29 = vpop.xlane.xlu1 %1386 }
 0x38a   : > { %2506 = vrcp.f32 %v1387_v29  ;;  %v1952_v29 = vld [vmem:[%s3071_s19 + $0x8] sm:$0xff] }
 0x38d   : > { %v1390_v30 = vpop.xlane.xlu0 %1389  ;;  %v1626_v34 = vpop.permute.xlu1 %1625 }
 0x38e   : > { %2508 = vrcp.f32 %v1390_v30  ;;  %v1953_v30 = vld [vmem:[%s3071_s19 + $0x10] sm:$0xff] }
 0x390   : > { %v2505_v31 = vpop.eup %2504 }
 0x391   : > { %v1396_v32 = vmul.f32 %v2505_v31, %v2497_v19  ;;  %v1550_v33 = vpop.permute.xlu0 %1549  ;;  %v2435_v31 = vpack.c.bf16 %v1952_v29, %v1951_v28 }
 0x392   : > { %2354 = vmatpush3.msra.mxu0 %v1550_v33 }
 0x393   : > { %2351 = vmatmul.mubr.msk.f32.vlgmr.msra.gmra.mrb[10].mxu1 %vm1036_vm2, %v1396_v32  ;;  %2422 = vmatprep.subr.bf16.mxu0 %v2580_v3  ;;  %v1954_v32 = vld [vmem:[%s3071_s19 + $0x18] sm:$0xff] }
 0x394   : > { %v2507_v35 = vpop.eup %2506  ;;  %2359 = vmatpush3.msra.mxu1 %v1626_v34  ;;  %2360 = vmatprep.mubr.msk.f32.mxu1 %vm2581_vm0, %v2582_v6  ;;  %v2438_v33 = vpack.c.bf16 %v1954_v32, %v1953_v30  ;;  %v1955_v34 = vld [vmem:[%s3071_s19 + $0x20] sm:$0xff] }
 0x395   : > { %v1397_v36 = vmul.f32 %v2507_v35, %v2499_v21  ;;  %2428 = vmatprep.subr.bf16.mxu1 %v2580_v3  ;;  %v1956_v35 = vld [vmem:[%s3071_s19 + $0x28] sm:$0xff] }
 0x397   : > { %2356 = vmatmul.mubr.msk.f32.vlgmr.msra.gmra.mrb[6].mxu0 %vm1036_vm2, %v1397_v36  ;;  %v2441_v36 = vpack.c.bf16 %v1956_v35, %v1955_v34 }
 0x398   : > { %v2509_v37 = vpop.eup %2508  ;;  %2371 = vmatprep.mubr.msk.f32.mxu0 %vm2581_vm0, %v2582_v6  ;;  %2424 = vmatpush3.bf16.msra.mxu0 %v2423_v43 }
 0x399   : > { %v1398_v38 = vmul.f32 %v2509_v37, %v2501_v23  ;;  %2425 = vmatprep.subr.bf16.mxu0 %v2580_v3  ;;  %v1866_v23 = vld [vmem:[%s3069_s17] sm:$0xff] }
 0x39a   : > { %v2429_v25 = vpack.c.bf16 %v1867_v24, %v1866_v23 }
 0x39b   : > { %2361 = vmatmul.mubr.msk.f32.vlgmr.msra.gmra.mrb[12].mxu1 %vm1036_vm2, %v1398_v38 }
 0x39c   : > { %2382 = vmatprep.mubr.msk.f32.mxu1 %vm2581_vm0, %v2582_v6  ;;  %2427 = vmatpush3.bf16.msra.mxu0 %v2426_v46  ;;  %v2227_v46 = vld [vmem:[%s3067_s15] ss:$0 sm:$0xff] }
 0x39d   : > { %2434 = vmatprep.subr.bf16.mxu0 %v2580_v3  ;;  %2430 = vmatpush3.bf16.msra.mxu1 %v2429_v25 }
 0x39e   : > { %2431 = vmatprep.subr.bf16.mxu1 %v2580_v3 }
 0x3fd   : > { %v1468_v39 = vpop.f32.mrb[4].mxu0 }
 0x3fe   : > { %v2347_v40 = vpop.f32.mrb[5].mxu0 }
 0x466   : > { %v1545_v47 = vpop.f32.mrb[10].mxu1 }
 0x467   : > { %1702 = vrot.lane.b32.xlu1 %v1545_v47, %s2586_s28  ;;  %v2352_v48 = vpop.f32.mrb[11].mxu1  ;;  %s2198_s28 = sshll.u32 %s753_s2, 3 }
 0x468   : > { %v2228_v48 = vld [vmem:[%s3068_s16] ss:$0 sm:$0xff]  ;;  %s755_s6 = scalar_lea.vmem [#allocation2], %s2198_s28  ;;  %s2520_s28 = sshll.u32 %s2589_s5, 4  ;;  %s2521_s28 = int_to_ptr.vmem [resolvable:$false] %s2520_s28 }
 0x469   : > { %s2087_s26 = sshll.u32 %s755_s6, 4  ;;  %s3011_s26 = int_to_ptr.vmem [resolvable:$true] %s2087_s26 }
 0x46a   : > { %v1621_v49 = vpop.f32.mrb[6].mxu0  ;;  %p2523_p0 = scmp.lt.s32.totalorder %s3011_s26, %s2521_s28 }
 0x46b   : > { %1706 = vrot.lane.b32.xlu0 %v1621_v49, %s2587_s0  ;;  %v2357_v50 = vpop.f32.mrb[7].mxu0  ;;  %s2074_s0 = scalar_lea.sflag [#allocation3], %s753_s2 }
 0x46c   : > { %v1957_v50 = vld [vmem:[%s3071_s19 + $0x30] sm:$0xff] }
 0x46e   : > { %v1697_v51 = vpop.f32.mrb[12].mxu1 }
 0x46f   : > { %1710 = vrot.lane.b32.xlu1 %v1697_v51, %s2588_s23  ;;  %v2362_v52 = vpop.f32.mrb[13].mxu1  ;;  %v1958_v51 = vld [vmem:[%s3071_s19 + $0x38] sm:$0xff]  ;;  %s2516_s23 = scalar_lea.vmem %s3011_s26, 128 }
 0x470   : > { %v2444_v52 = vpack.c.bf16 %v1958_v51, %v1957_v50  ;;  %p2517_p11 = scmp.ne.s32.totalorder %s3011_s26, %s2516_s23 }
 0x472   : > { %p2518_p12 = pnand %p2517_p11, %p2748_p5 }
 0x474   : > { %p2519_p13 = pneg %p2518_p12 }
 0x4d9   : > { %v1703_v53 = vpop.permute.xlu1 %1702 }
 0x4da   : > { %v1713_v55 = vsel %vm1036_vm2, %v1468_v39, %v1703_v53  ;;  %v2229_v53 = vld [vmem:[%s3070_s18] ss:$0 sm:$0xff] }
 0x4dd   : > { %v1707_v54 = vpop.permute.xlu0 %1706 }
 0x4de   : > { %v1715_v56 = vsel %vm1714_vm3, %v1713_v55, %v1707_v54 }
 0x4e1   : > { %v1711_v57 = vpop.permute.xlu1 %1710 }
 0x4e2   : > { %v1717_v58 = vsel %vm1716_vm4, %v1715_v56, %v1711_v57 }
 0x4e3   : > { %2372 = vmatmul.mubr.msk.f32.vlgmr.msra.gmra.mrb[8].mxu0 %vm794_vm1, %v1717_v58  ;;  %v2231_v58 = vld [vmem:[%s3072_s20] ss:$0 sm:$0xff] }
 0x4e4   : > { %2401 = vmatprep.mubr.msk.f32.mxu0 %vm2581_vm0, %v2582_v6  ;;  %2436 = vmatpush3.bf16.msra.mxu0 %v2435_v31 }
 0x4e5   : > { %2437 = vmatprep.subr.bf16.mxu0 %v2580_v3 }
 0x4e8   : > { %2439 = vmatpush3.bf16.msra.mxu0 %v2438_v33 }
 0x4e9   : > { %2440 = vmatprep.subr.bf16.mxu0 %v2580_v3 }
 0x4ec   : > { %2442 = vmatpush3.bf16.msra.mxu0 %v2441_v36 }
 0x4ed   : > { %2443 = vmatprep.subr.bf16.mxu0 %v2580_v3 }
 0x4f0   : > { %2445 = vmatpush3.bf16.msra.mxu0 %v2444_v52 }
 0x5b6   : > { %v1798_v60 = vpop.f32.mrb[8].mxu0 }
 0x5b7   : > { %v1799_v61 = vadd.f32 %v2223_v59, %v1798_v60  ;;  %v2373_v62 = vpop.f32.mrb[9].mxu0 }
 0x5b9   : > { %v1802_v63 = vadd.f32 %v1799_v61, %v2806_v13  ;;  %v2225_v13 = vld [vmem:[%s3065_s13] ss:$0 sm:$0xff] }
 0x5bb   : > { %v1805_v0 = vsel %vm794_vm1, %v1802_v63, 0.0  ;;  %v1808_v1 = vmul.f32 %v1802_v63, %v1802_v63 }
 0x5bc   : > { %1806 = vadd.xlane.f32.xlu0 %v1805_v0 }
 0x5bd   : > { %v1809_v2 = vsel %vm794_vm1, %v1808_v1, 0.0 }
 0x5be   : > { %1810 = vadd.xlane.f32.xlu1 %v1809_v2 }
 0x649   : > { %v1807_v4 = vpop.xlane.xlu0 %1806 }
 0x64a   : > { %v1812_v5 = vmul.f32 0.03125, %v1807_v4 }
 0x64b   : > { %v1811_v7 = vpop.xlane.xlu1 %1810 }
 0x64c   : > { %v1814_v6 = vmul.f32 %v1812_v5, %v1812_v5  ;;  %v1813_v8 = vmul.f32 0.03125, %v1811_v7  ;;  %v1816_v12 = vsub.f32 %v1802_v63, %v1812_v5 }
 0x64e   : > { %v1815_v9 = vsub.f32 %v1813_v8, %v1814_v6 }
 0x650   : > { %v1817_v11 = vadd.f32 1e-05, %v1815_v9 }
 0x652   : > { %2510 = vrsqrt.f32 %v1817_v11 }
 0x65c   : > { %v2511_v14 = vpop.eup %2510 }
 0x65d   : > { %v1819_v15 = vmul.f32 %v2511_v14, %v1816_v12  ;;  %v2233_v14 = vld [vmem:[%s3114_s22] ss:$0 sm:$0xff]  ;;  %s2522_s22 = scalar_lea.vmem %s2521_s28, 256 }
 0x65e   : > { %p2524_p1 = scmp.lt.s32.totalorder %s2522_s22, %s2516_s23 }
 0x65f   : > { %v1826_v17 = vmul.f32 %v2225_v13, %v1819_v15  ;;  %v2234_v15 = vld [vmem:[%s3115_s27] ss:$0 sm:$0xff] }
 0x660   : > { %p2525_p2 = por %p2524_p1, %p2523_p0 }
 0x661   : > { %v1833_v18 = vadd.f32 %v2226_v16, %v1826_v17 }
 0x662   : > { %p2526_p3 = pnand %p2525_p2, %p2519_p13 }
 0x663   : > { %v1834_v19 = vadd.f32 %v1833_v18, %v2798_v10  ;;  %v1868_v10 = vld [vmem:[%s3069_s17 + $0x10] sm:$0xff] }
 0x664   : > { %v2432_v27 = vpack.c.bf16 %v1869_v26, %v1868_v10 }
 0x665   : > { %v1837_v20 = vsel %vm794_vm1, %v1834_v19, 0.0  ;;  %v1840_v21 = vmul.f32 %v1834_v19, %v1834_v19 }
 0x666   : > { %1838 = vadd.xlane.f32.xlu0 %v1837_v20  ;;  %2433 = vmatpush3.bf16.msra.mxu1 %v2432_v27 }
 0x667   : > { %v1841_v22 = vsel %vm794_vm1, %v1840_v21, 0.0 }
 0x66a   : > { %1842 = vadd.xlane.f32.xlu0 %v1841_v22 }
 0x6f3   : > { %v1839_v37 = vpop.xlane.xlu0 %1838 }
 0x6f4   : > { %v1844_v38 = vmul.f32 0.03125, %v1839_v37 }
 0x6f6   : > { %v1846_v40 = vmul.f32 %v1844_v38, %v1844_v38  ;;  %v1848_v44 = vsub.f32 %v1834_v19, %v1844_v38 }
 0x6f7   : > { %v1843_v39 = vpop.xlane.xlu0 %1842 }
 0x6f8   : > { %v1845_v41 = vmul.f32 0.03125, %v1843_v39 }
 0x6fa   : > { %v1847_v42 = vsub.f32 %v1845_v41, %v1846_v40 }
 0x6fc   : > { %v1849_v43 = vadd.f32 1e-05, %v1847_v42 }
 0x6fe   : > { %2512 = vrsqrt.f32 %v1849_v43 }
 0x708   : > { %v2513_v45 = vpop.eup %2512 }
 0x709   : > { %v1851_v47 = vmul.f32 %v2513_v45, %v1848_v44 }
 0x70b   : > { %v1858_v3 = vmul.f32 %v2227_v46, %v1851_v47 }
 0x70d   : > { %v1865_v49 = vadd.f32 %v2228_v48, %v1858_v3 }
 0x70f   : > { %2383 = vmatmul.mubr.msk.f32.vlgmr.msra.gmra.mrb[14].mxu1 %vm794_vm1, %v1865_v49 }
 0x7e2   : > { %v1946_v54 = vpop.f32.mrb[14].mxu1 }
 0x7e3   : > { %v1947_v55 = vadd.f32 %v2229_v53, %v1946_v54  ;;  %v2384_v56 = vpop.f32.mrb[15].mxu1 }
 0x7e5   : > { %v1950_v57 = vmax.f32 %v1947_v55, 0.0 }
 0x7e7   : > { %2402 = vmatmul.mubr.msk.f32.vlgmr.msra.gmra.mrb[10].mxu0 %vm1966_vm5, %v1950_v57 }
 0x8ba   : > { %v2036_v59 = vpop.f32.mrb[10].mxu0 }
 0x8bb   : > { %v2037_v60 = vadd.f32 %v2231_v58, %v2036_v59  ;;  %v2403_v61 = vpop.f32.mrb[11].mxu0 }
 0x8bd   : > { %v2040_v62 = vadd.f32 %v2037_v60, %v1865_v49 }
 0x8bf   : > { %v2043_v63 = vsel %vm794_vm1, %v2040_v62, 0.0  ;;  %v2046_v0 = vmul.f32 %v2040_v62, %v2040_v62 }
 0x8c0   : > { %2044 = vadd.xlane.f32.xlu1 %v2043_v63 }
 0x8c1   : > { %v2047_v1 = vsel %vm794_vm1, %v2046_v0, 0.0 }
 0x8c2   : > { %2048 = vadd.xlane.f32.xlu0 %v2047_v1 }
 0x94d   : > { %v2045_v2 = vpop.xlane.xlu1 %2044 }
 0x94e   : > { %v2050_v4 = vmul.f32 0.03125, %v2045_v2 }
 0x94f   : > { %v2049_v5 = vpop.xlane.xlu0 %2048 }
 0x950   : > { %v2052_v7 = vmul.f32 %v2050_v4, %v2050_v4  ;;  %v2051_v6 = vmul.f32 0.03125, %v2049_v5  ;;  %v2054_v11 = vsub.f32 %v2040_v62, %v2050_v4 }
 0x952   : > { %v2053_v8 = vsub.f32 %v2051_v6, %v2052_v7 }
 0x954   : > { %v2055_v9 = vadd.f32 1e-05, %v2053_v8 }
 0x956   : > { %2514 = vrsqrt.f32 %v2055_v9 }
 0x960   : > { %v2515_v12 = vpop.eup %2514 }
 0x961   : > { %v2057_v13 = vmul.f32 %v2515_v12, %v2054_v11 }
 0x963   : > { %v2064_v16 = vmul.f32 %v2233_v14, %v2057_v13 }
 0x965   : > { %v2071_v17 = vadd.f32 %v2234_v15, %v2064_v16 }
 0x967   : > { %2072 = vst.msk [vmem:[%s755_s6] sm:$0xff] %vm794_vm1, %v2071_v17 }
 0x968   : > { %2529 = shalt.err (!%p2526_p3)
}
 0x969   : > { %s2530_s2 = scalar_lea.hbm %s3009_s3, 128  ;;  %s2534_s27 = scalar_lea.hbm %s3116_s1, 256 }
 0x96a   : > { %p2531_p4 = scmp.ne.s32.totalorder %s3009_s3, %s2530_s2  ;;  %p2535_p9 = scmp.lt.u32.totalorder %s3009_s3, %s3116_s1 }
 0x96b   : > { %p2536_p10 = scmp.lt.u32.totalorder %s2534_s27, %s2530_s2  ;;  %p2538_p12 = scmp.lt.u32.totalorder %s2530_s2, %s3009_s3 }
 0x96c   : > { %p2532_p7 = pnand %p2531_p4, %p2748_p5 }
 0x96d   : > { %p2537_p11 = por %p2536_p10, %p2535_p9 }
 0x96e   : > { %p2533_p8 = pneg %p2532_p7 }
 0x96f   : > { %p2539_p13 = por %p2538_p12, %p2537_p11 }
 0x971   : > { %p2540_p0 = pnand %p2539_p13, %p2533_p8 }
 0x973   : > { %2543 = shalt.err (!%p2540_p0)
}
 0x974   : > { %2446 = dma.vmem_to_hbm [thread:$0]  (%p2748_p5), %s3011_s26, 128, %s3009_s3, %s2074_s0  }
 0x975 PF: > { %s3117_s24 = sld [smem:[#allocation7_spill]]  ;;  %s3118_s29 = sld [smem:[#allocation5_spill]] }
 0x97b   : > { %p2452_p1 = scmp.ge.s32.totalorder %s3117_s24, 2  ;;  %s2099_s5 = sand.u32 1, %s3118_s29  }
 0x97c   : > { %s2100_s28 = scalar_lea.sflag [#allocation3], %s2099_s5 }
 0x97d   : > { %p2449_p2 = pnand %p2452_p1, %p2752_p6 }
 0x97f   : > { %2561 = dma.done.wait (!%p2449_p2), %s2100_s28, 128  }
 0x980   : > { %2563 = vsyncadd (!%p2449_p2), %s2100_s28, 4294967168  ;;  %s3120_s25 = sld [smem:[#allocation8_spill]]  ;;  %s3121_s22 = sld [smem:[#allocation6_spill]] }
 0x981   : > { %s3122_s24 = sld [smem:[#allocation9_spill]]  ;;  %s3123_s4 = smov %s2570_s30 }
 0x986   : > { %p33_p3 = scmp.ge.s32.totalorder %s3120_s25, 4   ;;  %s3124_s30 = smov %s3121_s22 }
 0x988   :  { %35 = sbr.rel (!%p33_p3) target bundleno = 15 (0xf), region = 159 }
 0x98f   :  { %2105 = vsyncpa [#allocation3], 1 }
 0x990   :  { %2107 = vsyncpa [#allocation3 + $0x1], 1 }

</bundles_post_ra>
